<compile_context>
chip_gen: v5e
topology: v5e:2x2
jax: 0.10.0
libtpu: 0.0.40
codegen_flags: <defaults>
</compile_context>

<pallas_src>
import jax
import jax.numpy as jnp
from jax.experimental import pallas as pl
from jax.experimental.pallas import tpu as pltpu


def _make_mlp_kernel(n_layers, apply_last_op, use_bf16):
    """Fused MLP kernel on a points-on-lanes [C, tile_n] slab."""
    dot_dtype = jnp.bfloat16 if use_bf16 else jnp.float32

    def kernel(*refs):
        # refs = (im, x, y, z, t, w0_im, w0_x, w0_y, w0_z, w0_t, b0,
        #         w1, b1, ..., o_ref)
        im_ref, x_ref, y_ref, z_ref, t_ref = refs[:5]
        o_ref = refs[-1]
        p_refs = refs[5:-1]
        w0_im, w0_x, w0_y, w0_z, w0_t, b0 = p_refs[:6]
        rest = p_refs[6:]

        # Layer 0: image-feature MXU dot + scalar-coordinate broadcast FMAs.
        h = jnp.dot(w0_im[...], im_ref[...].astype(dot_dtype),
                    preferred_element_type=jnp.float32)       # [C1, tile]
        h = h + b0[...]
        h = h + w0_x[...] * x_ref[...].astype(jnp.float32)
        h = h + w0_y[...] * y_ref[...].astype(jnp.float32)
        h = h + w0_z[...] * z_ref[...].astype(jnp.float32)
        h = h + w0_t[...] * t_ref[...].astype(jnp.float32)
        if n_layers > 1:
            h = jnp.tanh(h)

        # Remaining layers (LAAF scale already folded into the weights).
        for l in range(1, n_layers):
            wt = rest[2 * (l - 1)][...]                       # [C_out_l, C_in_l]
            bt = rest[2 * (l - 1) + 1][...]                   # [C_out_l, 1]
            h = jnp.dot(wt, h.astype(dot_dtype),
                        preferred_element_type=jnp.float32) + bt
            if l != n_layers - 1:
                h = jnp.tanh(h)

        if apply_last_op:
            # Per-output-channel activation written row-wise into the output:
            # row 0 -> sigmoid, rows 1..3 -> identity, row 4 -> exp.
            o_ref[0:1, :] = jax.nn.sigmoid(h[0:1, :]).astype(o_ref.dtype)
            o_ref[1:4, :] = h[1:4, :].astype(o_ref.dtype)
            o_ref[4:5, :] = jnp.exp(h[4:5, :]).astype(o_ref.dtype)
        else:
            o_ref[...] = h.astype(o_ref.dtype)

    return kernel


def _round_up(v, m):
    return ((v + m - 1) // m) * m


def _num_tensorcores():
    """Best-effort TensorCores-per-chip (v7x has 2; v5e/v6e have 1)."""
    try:
        info = pltpu.get_tpu_info()
        for name in ("num_cores", "cores_per_chip", "num_tensorcores",
                     "tensorcore_count"):
            v = getattr(info, name, None)
            if isinstance(v, int) and v > 0:
                return v
    except Exception:
        pass
    return 1


def _choose_tile_n(n_pts, tile_n, num_cores):
    """Lane-aligned tile; only shrink below tile_n to feed multiple TCs."""
    if n_pts <= 128:
        return n_pts                       # single full-extent block
    t = max(128, (min(tile_n, n_pts) // 128) * 128)
    if num_cores > 1:
        # Aim for >= 2 balanced grid steps per TensorCore so each core keeps
        # double-buffered DMA overlap -- but never drop below the ~512-lane
        # HBM-roofline efficiency knee.
        want_steps = 2 * num_cores
        balanced = _round_up(pl.cdiv(n_pts, want_steps), 128)
        if balanced >= 512:
            t = min(t, balanced)
    return t


def surface_classifier_laaf(im_feat, x_feat, y_feat, z_feat, t_feat, params,
                            *, laaf_scale=2.0, last_op=True, tile_n=8192,
                            use_bf16=True):
    """Forward pass. Inputs [1, C_i, N]; output [1, 5, N] when last_op=True."""
    coords = (x_feat, y_feat, z_feat, t_feat)
    assert all(c.shape[1] == 1 for c in coords), "x/y/z/t must be 1-channel"
    n_pts = im_feat.shape[2]
    c_im = im_feat.shape[1]
    c_in = c_im + 4

    n_layers = len(params)
    c_out = params[-1][1].shape[1]
    if last_op:
        assert c_out == 5, "last_op expects 5 output channels (alpha,u,v,w,p)"

    dot_dtype = jnp.bfloat16 if use_bf16 else jnp.float32

    # Fold LAAF scale into the (tiny) weights, pre-transpose for [C, N] layout,
    # and split the first layer by input feature group.
    flat = []
    for li, (a, w, b) in enumerate(params):
        w_scaled = w * (laaf_scale * a).reshape(-1, 1)       # [C_in_l, C_out_l]
        wt = jnp.swapaxes(w_scaled, 0, 1)                    # [C_out_l, C_in_l]
        bt = jnp.swapaxes(b, 0, 1).astype(jnp.float32)       # [C_out_l, 1]
        if li == 0:
            flat.append(wt[:, :c_im].astype(dot_dtype))      # image-feature cols
            flat += [wt[:, c_im + k:c_im + k + 1].astype(jnp.float32)
                     for k in range(4)]                      # x/y/z/t columns
            flat.append(bt)
        else:
            flat += [wt.astype(dot_dtype), bt]

    tile = _choose_tile_n(n_pts, tile_n, _num_tensorcores())
    grid = (pl.cdiv(n_pts, tile),)

    # Features tiled along the lane (N) axis; parameters stay resident in VMEM
    # across grid steps via constant index_maps.
    feats2d = [im_feat[0]] + [c[0] for c in coords]          # each [C_i, N]
    in_specs = [pl.BlockSpec((f.shape[0], tile), lambda i: (0, i))
                for f in feats2d]
    in_specs += [pl.BlockSpec(p.shape, lambda i: (0, 0)) for p in flat]
    out_spec = pl.BlockSpec((c_out, tile), lambda i: (0, i))

    # Advisory cost estimate (memory-bound streaming MLP).
    chans = [c_in] + [p[1].shape[1] for p in params]
    flops = 2 * n_pts * sum(a * b for a, b in zip(chans[:-1], chans[1:]))
    transcend = n_pts * (sum(chans[1:-1]) + (2 if last_op else 0))
    param_bytes = sum(int(p.size) * p.dtype.itemsize for p in flat)
    bytes_acc = 4 * n_pts * (c_in + c_out) + param_bytes

    kernel = _make_mlp_kernel(n_layers, last_op, use_bf16)

    out = pl.pallas_call(
        kernel,
        out_shape=jax.ShapeDtypeStruct((c_out, n_pts), jnp.float32),
        grid_spec=pltpu.PrefetchScalarGridSpec(
            num_scalar_prefetch=0,
            grid=grid,
            in_specs=in_specs,
            out_specs=out_spec,
        ),
        compiler_params=pltpu.CompilerParams(
            dimension_semantics=("parallel",)),
        cost_estimate=pl.CostEstimate(
            flops=flops, transcendentals=transcend, bytes_accessed=bytes_acc),
    )(*feats2d, *flat)

    if last_op:
        return out[None]                    # [1, C_out, N] -- lane-dense layout
    # Without last_op the PyTorch module returns a [N, C_out] tensor.
    return jnp.swapaxes(out, 0, 1)


def _reference(im_feat, x_feat, y_feat, z_feat, t_feat, params,
               laaf_scale=2.0, last_op=True):
    """Pure-JAX f32 reference mirroring the PyTorch module semantics."""
    y = jnp.concatenate([im_feat, x_feat, y_feat, z_feat, t_feat], axis=1)
    y = jnp.swapaxes(jnp.squeeze(y, axis=0), 0, 1)           # [N, C]
    for l, (a, w, b) in enumerate(params):
        y = ((laaf_scale * a) * y) @ w + b
        if l != len(params) - 1:
            y = jnp.tanh(y)
    if not last_op:
        return y
    y = jnp.swapaxes(y, 0, 1)[None]                          # [1, C_out, N]
    y = jnp.concatenate(
        [jax.nn.sigmoid(y[:, :1, :]), y[:, 1:2, :], y[:, 2:3, :],
         y[:, 3:4, :], jnp.exp(y[:, 4:5, :])], axis=1)
    return y


def _init_params(key, filter_channels, laaf_scale):
    """Deterministic AdaptiveLinear params: A = adaptive_rate = 1/scale,
    W/b drawn from a bounded uniform (nn.Linear-style)."""
    params = []
    adaptive_rate = 1.0 / laaf_scale
    for c_in, c_out in zip(filter_channels[:-1], filter_channels[1:]):
        key, kw, kb = jax.random.split(key, 3)
        bound = 1.0 / jnp.sqrt(jnp.float32(c_in))
        a = jnp.full((1, c_in), adaptive_rate, jnp.float32)
        w = jax.random.uniform(kw, (c_in, c_out), jnp.float32, -bound, bound)
        b = jax.random.uniform(kb, (1, c_out), jnp.float32, -bound, bound)
        params.append((a, w, b))
    return params


if __name__ == "__main__":
    LAAF_SCALE = 2.0
    # filter_channels: input = 16 (im_feat) + 4 (x,y,z,t) = 20; output = 5
    filter_channels = [20, 32, 32, 5]
    N = 256  # number of sampled points

    key = jax.random.PRNGKey(0)
    key, k_im, k_x, k_y, k_z, k_t, k_p = jax.random.split(key, 7)

    im_feat = jax.random.normal(k_im, (1, 16, N), jnp.float32)
    x_feat = jax.random.normal(k_x, (1, 1, N), jnp.float32)
    y_feat = jax.random.normal(k_y, (1, 1, N), jnp.float32)
    z_feat = jax.random.normal(k_z, (1, 1, N), jnp.float32)
    t_feat = jax.random.normal(k_t, (1, 1, N), jnp.float32)

    params = _init_params(k_p, filter_channels, LAAF_SCALE)

    out = surface_classifier_laaf(
        im_feat, x_feat, y_feat, z_feat, t_feat, params,
        laaf_scale=LAAF_SCALE, last_op=True, tile_n=8192, use_bf16=True)
    out = jax.block_until_ready(out)

    ref = _reference(im_feat, x_feat, y_feat, z_feat, t_feat, params,
                     laaf_scale=LAAF_SCALE, last_op=True)

    assert out.shape == (1, 5, N), out.shape
    # bf16 MXU operands with f32 accumulation -> loosened tolerance vs f32 ref.
    assert jnp.allclose(out, ref, atol=3e-2, rtol=3e-2), (
        "mismatch vs reference, max |diff| = %f"
        % float(jnp.max(jnp.abs(out - ref))))

    print("KERNEL_OK")
</pallas_src>

<mosaic_0001>
module attributes {stable_mosaic.version = 11 : i64} {
  func.func @kernel(%arg0: i32, %arg1: memref<16x256xf32, #tpu.memory_space<vmem>>, %arg2: memref<1x256xf32, #tpu.memory_space<vmem>>, %arg3: memref<1x256xf32, #tpu.memory_space<vmem>>, %arg4: memref<1x256xf32, #tpu.memory_space<vmem>>, %arg5: memref<1x256xf32, #tpu.memory_space<vmem>>, %arg6: memref<32x16xbf16, #tpu.memory_space<vmem>>, %arg7: memref<32x1xf32, #tpu.memory_space<vmem>>, %arg8: memref<32x1xf32, #tpu.memory_space<vmem>>, %arg9: memref<32x1xf32, #tpu.memory_space<vmem>>, %arg10: memref<32x1xf32, #tpu.memory_space<vmem>>, %arg11: memref<32x1xf32, #tpu.memory_space<vmem>>, %arg12: memref<32x32xbf16, #tpu.memory_space<vmem>>, %arg13: memref<32x1xf32, #tpu.memory_space<vmem>>, %arg14: memref<5x32xbf16, #tpu.memory_space<vmem>>, %arg15: memref<5x1xf32, #tpu.memory_space<vmem>>, %arg16: memref<5x256xf32, #tpu.memory_space<vmem>>) attributes {dimension_semantics = [#tpu.dimension_semantics<parallel>], iteration_bounds = array<i64: 1>, scalar_prefetch = 0 : i64, scratch_operands = 0 : i64, tpu.core_type = #tpu.core_type<tc>, window_params = [{transform_indices = @transform_0, window_bounds = array<i64: 16, 256>}, {transform_indices = @transform_1, window_bounds = array<i64: 1, 256>}, {transform_indices = @transform_2, window_bounds = array<i64: 1, 256>}, {transform_indices = @transform_3, window_bounds = array<i64: 1, 256>}, {transform_indices = @transform_4, window_bounds = array<i64: 1, 256>}, {pipeline_mode = #tpu.pipeline_mode<synchronous>, transform_indices = @transform_5, window_bounds = array<i64: 32, 16>}, {pipeline_mode = #tpu.pipeline_mode<synchronous>, transform_indices = @transform_6, window_bounds = array<i64: 32, 1>}, {pipeline_mode = #tpu.pipeline_mode<synchronous>, transform_indices = @transform_7, window_bounds = array<i64: 32, 1>}, {pipeline_mode = #tpu.pipeline_mode<synchronous>, transform_indices = @transform_8, window_bounds = array<i64: 32, 1>}, {pipeline_mode = #tpu.pipeline_mode<synchronous>, transform_indices = @transform_9, window_bounds = array<i64: 32, 1>}, {pipeline_mode = #tpu.pipeline_mode<synchronous>, transform_indices = @transform_10, window_bounds = array<i64: 32, 1>}, {pipeline_mode = #tpu.pipeline_mode<synchronous>, transform_indices = @transform_11, window_bounds = array<i64: 32, 32>}, {pipeline_mode = #tpu.pipeline_mode<synchronous>, transform_indices = @transform_12, window_bounds = array<i64: 32, 1>}, {pipeline_mode = #tpu.pipeline_mode<synchronous>, transform_indices = @transform_13, window_bounds = array<i64: 5, 32>}, {pipeline_mode = #tpu.pipeline_mode<synchronous>, transform_indices = @transform_14, window_bounds = array<i64: 5, 1>}, {transform_indices = @transform_15, window_bounds = array<i64: 5, 256>}]} {
    %c0 = arith.constant 0 : index
    %c0_0 = arith.constant 0 : index
    %0 = vector.load %arg6[%c0, %c0_0] : memref<32x16xbf16, #tpu.memory_space<vmem>>, vector<32x16xbf16>
    %c0_1 = arith.constant 0 : index
    %c0_2 = arith.constant 0 : index
    %1 = vector.load %arg1[%c0_1, %c0_2] : memref<16x256xf32, #tpu.memory_space<vmem>>, vector<16x256xf32>
    %2 = arith.truncf %1 : vector<16x256xf32> to vector<16x256xbf16>
    %cst = arith.constant dense<0.000000e+00> : vector<32x256xf32>
    %3 = tpu.matmul %0, %2, %cst {dimension_numbers = #tpu.dot_dimension_numbers<[1], [0], [0], [1], [0, 0, 1, 1], [], []>} : vector<32x16xbf16>, vector<16x256xbf16>, vector<32x256xf32> -> vector<32x256xf32>
    %c0_3 = arith.constant 0 : index
    %c0_4 = arith.constant 0 : index
    %4 = vector.load %arg11[%c0_3, %c0_4] : memref<32x1xf32, #tpu.memory_space<vmem>>, vector<32x1xf32>
    %5 = vector.broadcast %4 : vector<32x1xf32> to vector<32x256xf32>
    %6 = arith.addf %3, %5 : vector<32x256xf32>
    %c0_5 = arith.constant 0 : index
    %c0_6 = arith.constant 0 : index
    %7 = vector.load %arg7[%c0_5, %c0_6] : memref<32x1xf32, #tpu.memory_space<vmem>>, vector<32x1xf32>
    %c0_7 = arith.constant 0 : index
    %c0_8 = arith.constant 0 : index
    %8 = vector.load %arg2[%c0_7, %c0_8] : memref<1x256xf32, #tpu.memory_space<vmem>>, vector<1x256xf32>
    %9 = vector.broadcast %7 : vector<32x1xf32> to vector<32x256xf32>
    %10 = vector.broadcast %8 : vector<1x256xf32> to vector<32x256xf32>
    %11 = arith.mulf %9, %10 : vector<32x256xf32>
    %12 = arith.addf %6, %11 : vector<32x256xf32>
    %c0_9 = arith.constant 0 : index
    %c0_10 = arith.constant 0 : index
    %13 = vector.load %arg8[%c0_9, %c0_10] : memref<32x1xf32, #tpu.memory_space<vmem>>, vector<32x1xf32>
    %c0_11 = arith.constant 0 : index
    %c0_12 = arith.constant 0 : index
    %14 = vector.load %arg3[%c0_11, %c0_12] : memref<1x256xf32, #tpu.memory_space<vmem>>, vector<1x256xf32>
    %15 = vector.broadcast %13 : vector<32x1xf32> to vector<32x256xf32>
    %16 = vector.broadcast %14 : vector<1x256xf32> to vector<32x256xf32>
    %17 = arith.mulf %15, %16 : vector<32x256xf32>
    %18 = arith.addf %12, %17 : vector<32x256xf32>
    %c0_13 = arith.constant 0 : index
    %c0_14 = arith.constant 0 : index
    %19 = vector.load %arg9[%c0_13, %c0_14] : memref<32x1xf32, #tpu.memory_space<vmem>>, vector<32x1xf32>
    %c0_15 = arith.constant 0 : index
    %c0_16 = arith.constant 0 : index
    %20 = vector.load %arg4[%c0_15, %c0_16] : memref<1x256xf32, #tpu.memory_space<vmem>>, vector<1x256xf32>
    %21 = vector.broadcast %19 : vector<32x1xf32> to vector<32x256xf32>
    %22 = vector.broadcast %20 : vector<1x256xf32> to vector<32x256xf32>
    %23 = arith.mulf %21, %22 : vector<32x256xf32>
    %24 = arith.addf %18, %23 : vector<32x256xf32>
    %c0_17 = arith.constant 0 : index
    %c0_18 = arith.constant 0 : index
    %25 = vector.load %arg10[%c0_17, %c0_18] : memref<32x1xf32, #tpu.memory_space<vmem>>, vector<32x1xf32>
    %c0_19 = arith.constant 0 : index
    %c0_20 = arith.constant 0 : index
    %26 = vector.load %arg5[%c0_19, %c0_20] : memref<1x256xf32, #tpu.memory_space<vmem>>, vector<1x256xf32>
    %27 = vector.broadcast %25 : vector<32x1xf32> to vector<32x256xf32>
    %28 = vector.broadcast %26 : vector<1x256xf32> to vector<32x256xf32>
    %29 = arith.mulf %27, %28 : vector<32x256xf32>
    %30 = arith.addf %24, %29 : vector<32x256xf32>
    %31 = math.tanh %30 : vector<32x256xf32>
    %c0_21 = arith.constant 0 : index
    %c0_22 = arith.constant 0 : index
    %32 = vector.load %arg12[%c0_21, %c0_22] : memref<32x32xbf16, #tpu.memory_space<vmem>>, vector<32x32xbf16>
    %c0_23 = arith.constant 0 : index
    %c0_24 = arith.constant 0 : index
    %33 = vector.load %arg13[%c0_23, %c0_24] : memref<32x1xf32, #tpu.memory_space<vmem>>, vector<32x1xf32>
    %34 = arith.truncf %31 : vector<32x256xf32> to vector<32x256xbf16>
    %cst_25 = arith.constant dense<0.000000e+00> : vector<32x256xf32>
    %35 = tpu.matmul %32, %34, %cst_25 {dimension_numbers = #tpu.dot_dimension_numbers<[1], [0], [0], [1], [0, 0, 1, 1], [], []>} : vector<32x32xbf16>, vector<32x256xbf16>, vector<32x256xf32> -> vector<32x256xf32>
    %36 = vector.broadcast %33 : vector<32x1xf32> to vector<32x256xf32>
    %37 = arith.addf %35, %36 : vector<32x256xf32>
    %38 = math.tanh %37 : vector<32x256xf32>
    %c0_26 = arith.constant 0 : index
    %c0_27 = arith.constant 0 : index
    %39 = vector.load %arg14[%c0_26, %c0_27] : memref<5x32xbf16, #tpu.memory_space<vmem>>, vector<5x32xbf16>
    %c0_28 = arith.constant 0 : index
    %c0_29 = arith.constant 0 : index
    %40 = vector.load %arg15[%c0_28, %c0_29] : memref<5x1xf32, #tpu.memory_space<vmem>>, vector<5x1xf32>
    %41 = arith.truncf %38 : vector<32x256xf32> to vector<32x256xbf16>
    %cst_30 = arith.constant dense<0.000000e+00> : vector<5x256xf32>
    %42 = tpu.matmul %39, %41, %cst_30 {dimension_numbers = #tpu.dot_dimension_numbers<[1], [0], [0], [1], [0, 0, 1, 1], [], []>} : vector<5x32xbf16>, vector<32x256xbf16>, vector<5x256xf32> -> vector<5x256xf32>
    %43 = vector.broadcast %40 : vector<5x1xf32> to vector<5x256xf32>
    %44 = arith.addf %42, %43 : vector<5x256xf32>
    %45 = vector.extract_strided_slice %44 {offsets = [0, 0], sizes = [1, 256], strides = [1, 1]} : vector<5x256xf32> to vector<1x256xf32>
    %46 = arith.negf %45 : vector<1x256xf32>
    %47 = math.exp %46 : vector<1x256xf32>
    %cst_31 = arith.constant 1.000000e+00 : f32
    %48 = vector.broadcast %cst_31 : f32 to vector<1x256xf32>
    %49 = arith.addf %48, %47 : vector<1x256xf32>
    %50 = arith.divf %48, %49 : vector<1x256xf32>
    %c0_32 = arith.constant 0 : index
    %c0_33 = arith.constant 0 : index
    %51 = vector.load %arg16[%c0_32, %c0_33] : memref<5x256xf32, #tpu.memory_space<vmem>>, vector<1x256xf32>
    tpu.vector_store %arg16[%c0_32, %c0_33], %50 {strides = array<i32>} : memref<5x256xf32, #tpu.memory_space<vmem>>, vector<1x256xf32>,
    %52 = vector.extract_strided_slice %44 {offsets = [1, 0], sizes = [3, 256], strides = [1, 1]} : vector<5x256xf32> to vector<3x256xf32>
    %c1 = arith.constant 1 : index
    %c0_34 = arith.constant 0 : index
    %53 = vector.load %arg16[%c1, %c0_34] : memref<5x256xf32, #tpu.memory_space<vmem>>, vector<3x256xf32>
    tpu.vector_store %arg16[%c1, %c0_34], %52 {strides = array<i32>} : memref<5x256xf32, #tpu.memory_space<vmem>>, vector<3x256xf32>,
    %54 = vector.extract_strided_slice %44 {offsets = [4, 0], sizes = [1, 256], strides = [1, 1]} : vector<5x256xf32> to vector<1x256xf32>
    %55 = math.exp %54 : vector<1x256xf32>
    %c4 = arith.constant 4 : index
    %c0_35 = arith.constant 0 : index
    %56 = vector.load %arg16[%c4, %c0_35] : memref<5x256xf32, #tpu.memory_space<vmem>>, vector<1x256xf32>
    tpu.vector_store %arg16[%c4, %c0_35], %55 {strides = array<i32>} : memref<5x256xf32, #tpu.memory_space<vmem>>, vector<1x256xf32>,
    return
  }
  func.func @transform_0(%arg0: i32) -> (i32, i32) {
    %c0_i32 = arith.constant 0 : i32
    %c0_i32_0 = arith.constant 0 : i32
    return %c0_i32, %arg0 : i32, i32
  }
  func.func @transform_1(%arg0: i32) -> (i32, i32) {
    %c0_i32 = arith.constant 0 : i32
    %c0_i32_0 = arith.constant 0 : i32
    return %c0_i32, %arg0 : i32, i32
  }
  func.func @transform_2(%arg0: i32) -> (i32, i32) {
    %c0_i32 = arith.constant 0 : i32
    %c0_i32_0 = arith.constant 0 : i32
    return %c0_i32, %arg0 : i32, i32
  }
  func.func @transform_3(%arg0: i32) -> (i32, i32) {
    %c0_i32 = arith.constant 0 : i32
    %c0_i32_0 = arith.constant 0 : i32
    return %c0_i32, %arg0 : i32, i32
  }
  func.func @transform_4(%arg0: i32) -> (i32, i32) {
    %c0_i32 = arith.constant 0 : i32
    %c0_i32_0 = arith.constant 0 : i32
    return %c0_i32, %arg0 : i32, i32
  }
  func.func @transform_5(%arg0: i32) -> (i32, i32) {
    %c0_i32 = arith.constant 0 : i32
    %c0_i32_0 = arith.constant 0 : i32
    %c0_i32_1 = arith.constant 0 : i32
    return %c0_i32, %c0_i32_0 : i32, i32
  }
  func.func @transform_6(%arg0: i32) -> (i32, i32) {
    %c0_i32 = arith.constant 0 : i32
    %c0_i32_0 = arith.constant 0 : i32
    %c0_i32_1 = arith.constant 0 : i32
    return %c0_i32, %c0_i32_0 : i32, i32
  }
  func.func @transform_7(%arg0: i32) -> (i32, i32) {
    %c0_i32 = arith.constant 0 : i32
    %c0_i32_0 = arith.constant 0 : i32
    %c0_i32_1 = arith.constant 0 : i32
    return %c0_i32, %c0_i32_0 : i32, i32
  }
  func.func @transform_8(%arg0: i32) -> (i32, i32) {
    %c0_i32 = arith.constant 0 : i32
    %c0_i32_0 = arith.constant 0 : i32
    %c0_i32_1 = arith.constant 0 : i32
    return %c0_i32, %c0_i32_0 : i32, i32
  }
  func.func @transform_9(%arg0: i32) -> (i32, i32) {
    %c0_i32 = arith.constant 0 : i32
    %c0_i32_0 = arith.constant 0 : i32
    %c0_i32_1 = arith.constant 0 : i32
    return %c0_i32, %c0_i32_0 : i32, i32
  }
  func.func @transform_10(%arg0: i32) -> (i32, i32) {
    %c0_i32 = arith.constant 0 : i32
    %c0_i32_0 = arith.constant 0 : i32
    %c0_i32_1 = arith.constant 0 : i32
    return %c0_i32, %c0_i32_0 : i32, i32
  }
  func.func @transform_11(%arg0: i32) -> (i32, i32) {
    %c0_i32 = arith.constant 0 : i32
    %c0_i32_0 = arith.constant 0 : i32
    %c0_i32_1 = arith.constant 0 : i32
    return %c0_i32, %c0_i32_0 : i32, i32
  }
  func.func @transform_12(%arg0: i32) -> (i32, i32) {
    %c0_i32 = arith.constant 0 : i32
    %c0_i32_0 = arith.constant 0 : i32
    %c0_i32_1 = arith.constant 0 : i32
    return %c0_i32, %c0_i32_0 : i32, i32
  }
  func.func @transform_13(%arg0: i32) -> (i32, i32) {
    %c0_i32 = arith.constant 0 : i32
    %c0_i32_0 = arith.constant 0 : i32
    %c0_i32_1 = arith.constant 0 : i32
    return %c0_i32, %c0_i32_0 : i32, i32
  }
  func.func @transform_14(%arg0: i32) -> (i32, i32) {
    %c0_i32 = arith.constant 0 : i32
    %c0_i32_0 = arith.constant 0 : i32
    %c0_i32_1 = arith.constant 0 : i32
    return %c0_i32, %c0_i32_0 : i32, i32
  }
  func.func @transform_15(%arg0: i32) -> (i32, i32) {
    %c0_i32 = arith.constant 0 : i32
    %c0_i32_0 = arith.constant 0 : i32
    return %c0_i32, %arg0 : i32, i32
  }
}

</mosaic_0001>

<bundles_post_ra>
// kernel: tpu_custom_call.1
= control target key start
LH: loop header
LB: loop body
LE: loop exit
PB: predicated region body
PF: predicated region fallthrough
CT: control target
= control target key end

     0   :  { %v657_v3 = vmov 0   ;;  %vm96_vm0 = vcmask 130048   ;;  %s902_s0 = inlined_call_operand.vmem [shape: f32[16,256], index: 0, kind: input, shape index: {}]   ;;  %s903_s1 = inlined_call_operand.vmem [shape: f32[1,256], index: 1, kind: input, shape index: {}]   ;;  %s904_s2 = inlined_call_operand.vmem [shape: f32[1,256], index: 2, kind: input, shape index: {}]   ;;  %s905_s3 = inlined_call_operand.vmem [shape: f32[1,256], index: 3, kind: input, shape index: {}]   ;;  %s906_s4 = inlined_call_operand.vmem [shape: f32[1,256], index: 4, kind: input, shape index: {}]   ;;  %s907_s5 = inlined_call_operand.vmem [shape: bf16[32,16], index: 5, kind: input, shape index: {}]   ;;  %s908_s6 = inlined_call_operand.vmem [shape: f32[32,1], index: 6, kind: input, shape index: {}]   ;;  %s909_s7 = inlined_call_operand.vmem [shape: f32[32,1], index: 7, kind: input, shape index: {}]   ;;  %s910_s8 = inlined_call_operand.vmem [shape: f32[32,1], index: 8, kind: input, shape index: {}]   ;;  %s911_s9 = inlined_call_operand.vmem [shape: f32[32,1], index: 9, kind: input, shape index: {}]   ;;  %s912_s10 = inlined_call_operand.vmem [shape: f32[32,1], index: 10, kind: input, shape index: {}]   ;;  %s913_s11 = inlined_call_operand.vmem [shape: bf16[32,32], index: 11, kind: input, shape index: {}]   ;;  %s914_s12 = inlined_call_operand.vmem [shape: f32[32,1], index: 12, kind: input, shape index: {}]   ;;  %s915_s13 = inlined_call_operand.vmem [shape: bf16[5,32], index: 13, kind: input, shape index: {}]   ;;  %s916_s14 = inlined_call_operand.vmem [shape: f32[5,1], index: 14, kind: input, shape index: {}]   ;;  %s917_s15 = inlined_call_operand.hbm [shape: f32[5,256], index: 15, kind: output, shape index: {}]  }
   0x1   :  { %v189_v0 = vld [vmem:[%s909_s7 + $0x10] sm:$0xff]  ;;  %586 = vset.pattern.permute.xlu2 %v657_v3  ;;  %585 = vset.pattern.permute.xlu1 %v657_v3  ;;  %v56_v4 = vld [vmem:[%s902_s0] sm:$0xff]  ;;  %v57_v6 = vld [vmem:[%s902_s0 + $0x8] sm:$0xff] }
   0x2   :  { %v143_v1 = vld [vmem:[%s908_s6 + $0x10] sm:$0xff]  ;;  %584 = vset.pattern.permute.xlu0 %v657_v3  ;;  %204 = vperm.xlu2 %586, %v189_v0   ;;  %v59_v8 = vld [vmem:[%s902_s0 + $0x18] sm:$0xff]  ;;  %v578_v10 = vld [vmem:[%s907_s5] sm:$0xff] }
   0x3   :  { %v64_v2 = vld [vmem:[%s912_s10 + $0x10] sm:$0xff]  ;;  %158 = vperm.xlu1 %585, %v143_v1   ;;  %v61_v9 = vpack.c.bf16 %v59_v8, %v57_v6  ;;  %v190_v11 = vld [vmem:[%s909_s7 + $0x18] sm:$0xff] }
   0x4   :  { %v58_v5 = vld [vmem:[%s902_s0 + $0x10] sm:$0xff]  ;;  %78 = vperm.xlu0 %584, %v64_v2  }
   0x5   :  { %v60_v7 = vpack.c.bf16 %v58_v5, %v56_v4  ;;  %129 = vmatpush.bf16.msra.mxu1 %v61_v9 }
   0x7   :  { %110 = vmatpush.bf16.msra.mxu0 %v60_v7 }
   0xa   :  { %558 = vmatmul.msk.bf16.vlgmr.msra.gmra.mxu0 %vm96_vm0, %v578_v10 }
   0xb   :  { %20 = vsyncpa [#allocation3], 0  ;;  %560 = vmatmul.msk.bf16.vlgmr.msra.gmra.mxu1 %vm96_vm0, %v578_v10  ;;  %v144_v12 = vld [vmem:[%s908_s6 + $0x18] sm:$0xff]  ;;  %209 = vperm.xlu2 %586, %v190_v11   ;;  %v141_v14 = vld [vmem:[%s908_s6] sm:$0xff]  ;;  %vm375_vm1 = vcmask 261120   ;;  %s541_s17 = sshll.u32 %s917_s15, 4  ;;  %s542_s17 = int_to_ptr.hbm [resolvable:$true] %s541_s17 }
   0xc   :  { %v65_v13 = vld [vmem:[%s912_s10 + $0x18] sm:$0xff]  ;;  %163 = vperm.xlu1 %585, %v144_v12   ;;  %v63_v15 = vld [vmem:[%s912_s10 + $0x8] sm:$0xff]  ;;  %v62_v16 = vld [vmem:[%s912_s10] sm:$0xff]  ;;  %vm509_vm10 = vcmask 1040384  }
   0xd   :  { %83 = vperm.xlu0 %584, %v65_v13   ;;  %v579_v17 = vld [vmem:[%s907_s5 + $0x8] sm:$0xff]  ;;  %v236_v18 = vld [vmem:[%s910_s8 + $0x18] sm:$0xff]  ;;  %v235_v19 = vld [vmem:[%s910_s8 + $0x10] sm:$0xff] }
   0xe   :  { %v142_v20 = vld [vmem:[%s908_s6 + $0x8] sm:$0xff]  ;;  %v281_v21 = vld [vmem:[%s911_s9 + $0x10] sm:$0xff]  ;;  %v187_v23 = vld [vmem:[%s909_s7] sm:$0xff] }
   0xf   :  { %v188_v22 = vld [vmem:[%s909_s7 + $0x8] sm:$0xff]  ;;  %v233_v25 = vld [vmem:[%s910_s8] sm:$0xff]  ;;  %v282_v26 = vld [vmem:[%s911_s9 + $0x18] sm:$0xff] }
  0x10   :  { %v234_v24 = vld [vmem:[%s910_s8 + $0x8] sm:$0xff]  ;;  %v339_v27 = vld [vmem:[%s914_s12 + $0x10] sm:$0xff]  ;;  %v279_v29 = vld [vmem:[%s911_s9] sm:$0xff] }
  0x11   :  { %v280_v28 = vld [vmem:[%s911_s9 + $0x8] sm:$0xff]  ;;  %v337_v31 = vld [vmem:[%s914_s12] sm:$0xff]  ;;  %v340_v32 = vld [vmem:[%s914_s12 + $0x18] sm:$0xff] }
  0x12   :  { %v338_v30 = vld [vmem:[%s914_s12 + $0x8] sm:$0xff]  ;;  %v429_v33 = vld [vmem:[%s916_s14] sm:$0x1f] }
  0x13   :  { %148 = vperm.xlu2 %586, %v141_v14   ;;  %v145_v49 = vld [vmem:[%s903_s1] sm:$0x3] }
  0x14   :  { %73 = vperm.xlu1 %585, %v63_v15   ;;  %v191_v51 = vld [vmem:[%s904_s2] sm:$0x3]  ;;  %v167_v52 = vperm.slane %v145_v49, 0  ;;  %v168_v53 = vperm.slane %v145_v49, 1 }
  0x15   :  { %68 = vperm.xlu0 %584, %v62_v16   ;;  %v237_v54 = vld [vmem:[%s905_s3] sm:$0x3]  ;;  %v213_v56 = vperm.slane %v191_v51, 0  ;;  %v214_v57 = vperm.slane %v191_v51, 1 }
  0x16   :  { %v283_v58 = vld [vmem:[%s906_s4] sm:$0x3]  ;;  %v259_v60 = vperm.slane %v237_v54, 0  ;;  %v850_v61 = vperm.slane %v237_v54, 1 }
  0x17   :  { %v852_v3 = vperm.slane %v283_v58, 0  ;;  %v854_v8 = vperm.slane %v283_v58, 1 }
  0x1a   :  { %559 = vmatmul.msk.bf16.gmra.mxu0 %vm96_vm0, %v579_v17 }
  0x1b   :  { %561 = vmatmul.msk.bf16.gmra.mxu1 %vm96_vm0, %v579_v17  ;;  %255 = vperm.xlu2 %586, %v236_v18  }
  0x1c   :  { %250 = vperm.xlu1 %585, %v235_v19  }
  0x1d   :  { %153 = vperm.xlu0 %584, %v142_v20  }
  0x23   :  { %296 = vperm.xlu2 %586, %v281_v21  }
  0x24   :  { %199 = vperm.xlu1 %585, %v188_v22  }
  0x25   :  { %194 = vperm.xlu0 %584, %v187_v23  }
  0x2b   :  { %245 = vperm.xlu2 %586, %v234_v24  }
  0x2c   :  { %240 = vperm.xlu1 %585, %v233_v25  }
  0x2d   :  { %301 = vperm.xlu0 %584, %v282_v26  }
  0x33   :  { %357 = vperm.xlu2 %586, %v339_v27  }
  0x34   :  { %291 = vperm.xlu1 %585, %v280_v28  }
  0x35   :  { %286 = vperm.xlu0 %584, %v279_v29  }
  0x3b   :  { %352 = vperm.xlu2 %586, %v338_v30  }
  0x3c   :  { %347 = vperm.xlu1 %585, %v337_v31  }
  0x3d   :  { %362 = vperm.xlu0 %584, %v340_v32  }
  0x45   :  { %436 = vperm.xlu0 %584, %v429_v33  }
  0x5c   :  { %v205_v34 = vpop.permute.xlu2 %204 }
  0x5d   :  { %v221_v6 = vmul.f32 %v213_v56, %v205_v34  ;;  %v222_v7 = vmul.f32 %v214_v57, %v205_v34 }
  0x65   :  { %v210_v35 = vpop.permute.xlu2 %209 }
  0x66   :  { %v223_v10 = vmul.f32 %v213_v56, %v210_v35  ;;  %v224_v11 = vmul.f32 %v214_v57, %v210_v35 }
  0x6d   :  { %v149_v40 = vpop.permute.xlu2 %148 }
  0x6e   :  { %v171_v12 = vmul.f32 %v167_v52, %v149_v40  ;;  %v172_v14 = vmul.f32 %v168_v53, %v149_v40 }
  0x75   :  { %v159_v36 = vpop.permute.xlu1 %158  ;;  %v256_v45 = vpop.permute.xlu2 %255 }
  0x76   :  { %v79_v37 = vpop.permute.xlu0 %78  ;;  %v175_v62 = vmul.f32 %v167_v52, %v159_v36  ;;  %v176_v2 = vmul.f32 %v168_v53, %v159_v36  ;;  %v269_v15 = vmul.f32 %v259_v60, %v256_v45  ;;  %v270_v16 = vmul.f32 %v850_v61, %v256_v45 }
  0x7d   :  { %v297_v55 = vpop.permute.xlu2 %296 }
  0x7e   :  { %v164_v38 = vpop.permute.xlu1 %163  ;;  %v313_v18 = vmul.f32 %v852_v3, %v297_v55  ;;  %v314_v22 = vmul.f32 %v854_v8, %v297_v55 }
  0x7f   :  { %v836_v39 = vpop.permute.xlu0 %83  ;;  %v177_v26 = vmul.f32 %v167_v52, %v164_v38  ;;  %v178_v32 = vmul.f32 %v168_v53, %v164_v38 }
  0x85   :  { %v246_v27 = vpop.permute.xlu2 %245 }
  0x86   :  { %v74_v43 = vpop.permute.xlu1 %73  ;;  %v265_v49 = vmul.f32 %v259_v60, %v246_v27 }
  0x87   :  { %v112_v41 = vpop.f32.mrf.mxu0  ;;  %v69_v44 = vpop.permute.xlu0 %68 }
  0x88   :  { %v131_v42 = vpop.f32.mrf.mxu1  ;;  %v113_v28 = vadd.f32 %v112_v41, %v69_v44 }
  0x89   :  { %v132_v40 = vadd.f32 %v131_v42, %v69_v44 }
  0x8b   :  { %v180_v42 = vadd.f32 %v172_v14, %v132_v40 }
  0x8e   :  { %v251_v48 = vpop.permute.xlu1 %250 }
  0x8f   :  { %v114_v46 = vpop.f32.mrf.mxu0  ;;  %v154_v50 = vpop.permute.xlu0 %153  ;;  %v267_v24 = vmul.f32 %v259_v60, %v251_v48  ;;  %v268_v29 = vmul.f32 %v850_v61, %v251_v48  ;;  %v179_v48 = vadd.f32 %v171_v12, %v113_v28 }
  0x90   :  { %v133_v47 = vpop.f32.mrf.mxu1  ;;  %v115_v19 = vadd.f32 %v114_v46, %v74_v43  ;;  %v173_v20 = vmul.f32 %v167_v52, %v154_v50  ;;  %v174_v25 = vmul.f32 %v168_v53, %v154_v50 }
  0x91   :  { %v134_v23 = vadd.f32 %v133_v47, %v74_v43 }
  0x92   :  { %v181_v45 = vadd.f32 %v173_v20, %v115_v19 }
  0x93   :  { %v182_v50 = vadd.f32 %v174_v25, %v134_v23 }
  0x96   :  { %v200_v1 = vpop.permute.xlu1 %199 }
  0x97   :  { %v117_v59 = vpop.f32.mrf.mxu0  ;;  %v195_v5 = vpop.permute.xlu0 %194  ;;  %v219_v30 = vmul.f32 %v213_v56, %v200_v1  ;;  %v220_v34 = vmul.f32 %v214_v57, %v200_v1 }
  0x98   :  { %v118_v63 = vadd.f32 %v117_v59, %v79_v37  ;;  %v136_v0 = vpop.f32.mrf.mxu1  ;;  %v217_v41 = vmul.f32 %v213_v56, %v195_v5  ;;  %v218_v54 = vmul.f32 %v214_v57, %v195_v5 }
  0x99   :  { %v137_v4 = vadd.f32 %v136_v0, %v79_v37  ;;  %v227_v52 = vadd.f32 %v219_v30, %v181_v45  ;;  %v228_v53 = vadd.f32 %v220_v34, %v182_v50  ;;  %v580_v30 = vld [vmem:[%s913_s11] sm:$0xff] }
  0x9a   :  { %v183_v9 = vadd.f32 %v175_v62, %v118_v63  ;;  %v266_v62 = vmul.f32 %v850_v61, %v246_v27  ;;  %v225_v0 = vadd.f32 %v217_v41, %v179_v48 }
  0x9b   :  { %v184_v13 = vadd.f32 %v176_v2, %v137_v4  ;;  %v226_v2 = vadd.f32 %v218_v54, %v180_v42  ;;  %v273_v5 = vadd.f32 %v265_v49, %v227_v52 }
  0x9c   :  { %v229_v17 = vadd.f32 %v221_v6, %v183_v9  ;;  %v274_v9 = vadd.f32 %v266_v62, %v228_v53 }
  0x9d   :  { %v230_v21 = vadd.f32 %v222_v7, %v184_v13 }
  0x9e   :  { %v275_v33 = vadd.f32 %v267_v24, %v229_v17  ;;  %v241_v37 = vpop.permute.xlu1 %240 }
  0x9f   :  { %v119_v31 = vpop.f32.mrf.mxu0  ;;  %v276_v46 = vadd.f32 %v268_v29, %v230_v21  ;;  %v302_v47 = vpop.permute.xlu0 %301  ;;  %v263_v58 = vmul.f32 %v259_v60, %v241_v37 }
  0xa0   :  { %v120_v35 = vadd.f32 %v119_v31, %v836_v39  ;;  %v138_v36 = vpop.f32.mrf.mxu1  ;;  %v321_v59 = vadd.f32 %v313_v18, %v275_v33  ;;  %v315_v56 = vmul.f32 %v852_v3, %v302_v47  ;;  %v316_v57 = vmul.f32 %v854_v8, %v302_v47  ;;  %v581_v31 = vld [vmem:[%s913_s11 + $0x8] sm:$0xff] }
  0xa1   :  { %v139_v43 = vadd.f32 %v138_v36, %v836_v39  ;;  %v322_v63 = vadd.f32 %v314_v22, %v276_v46  ;;  %v264_v39 = vmul.f32 %v850_v61, %v241_v37  ;;  %v271_v6 = vadd.f32 %v263_v58, %v225_v0  ;;  %v358_v36 = vpop.permute.xlu2 %357 }
  0xa2   :  { %v185_v51 = vadd.f32 %v177_v26, %v120_v35  ;;  %587 = vtanh.f32 %v321_v59 }
  0xa3   :  { %v186_v38 = vadd.f32 %v178_v32, %v139_v43  ;;  %589 = vtanh.f32 %v322_v63  ;;  %v272_v61 = vadd.f32 %v264_v39, %v226_v2 }
  0xa4   :  { %v231_v55 = vadd.f32 %v223_v10, %v185_v51 }
  0xa5   :  { %v232_v44 = vadd.f32 %v224_v11, %v186_v38 }
  0xa6   :  { %v277_v1 = vadd.f32 %v269_v15, %v231_v55  ;;  %v292_v60 = vpop.permute.xlu1 %291 }
  0xa7   :  { %v278_v4 = vadd.f32 %v270_v16, %v232_v44  ;;  %v311_v11 = vmul.f32 %v852_v3, %v292_v60  ;;  %v312_v12 = vmul.f32 %v854_v8, %v292_v60  ;;  %v287_v13 = vpop.permute.xlu0 %286 }
  0xa8   :  { %v323_v7 = vadd.f32 %v315_v56, %v277_v1  ;;  %v309_v14 = vmul.f32 %v852_v3, %v287_v13  ;;  %v310_v15 = vmul.f32 %v854_v8, %v287_v13  ;;  %v588_v20 = vpop.eup %587 }
  0xa9   :  { %v324_v10 = vadd.f32 %v316_v57, %v278_v4  ;;  %v319_v16 = vadd.f32 %v311_v11, %v273_v5  ;;  %v320_v17 = vadd.f32 %v312_v12, %v274_v9  ;;  %v590_v21 = vpop.eup %589  ;;  %v353_v43 = vpop.permute.xlu2 %352  ;;  %v428_v4 = vld [vmem:[%s915_s13] sm:$0x7]  ;;  %s658_s13 = smov [#allocation2]  }
  0xaa   :  { %591 = vtanh.f32 %v323_v7  ;;  %v317_v18 = vadd.f32 %v309_v14, %v271_v6  ;;  %v318_v19 = vadd.f32 %v310_v15, %v272_v61  ;;  %s539_s30 = sshll.u32 %s658_s13, 4  ;;  %s540_s30 = int_to_ptr.vmem [resolvable:$true] %s539_s30 }
  0xab   :  { %593 = vtanh.f32 %v324_v10 }
  0xac   :  { %595 = vtanh.f32 %v319_v16 }
  0xad   :  { %597 = vtanh.f32 %v320_v17 }
  0xae   :  { %599 = vtanh.f32 %v317_v18  ;;  %v348_v48 = vpop.permute.xlu1 %347 }
  0xaf   :  { %601 = vtanh.f32 %v318_v19  ;;  %v363_v47 = vpop.permute.xlu0 %362 }
  0xb0   :  { %v592_v22 = vpop.eup %591 }
  0xb1   :  { %v594_v23 = vpop.eup %593  ;;  %v343_v24 = vpack.c.bf16 %v592_v22, %v588_v20  ;;  %v512_v20 = vlaneseq }
  0xb2   :  { %v344_v25 = vpack.c.bf16 %v594_v23, %v590_v21  ;;  %v596_v26 = vpop.eup %595 }
  0xb3   :  { %388 = vmatpush.bf16.msra.mxu2 %v343_v24  ;;  %v598_v3 = vpop.eup %597  ;;  %vm885_vm2 = vcmp.lt.s32.totalorder %v512_v20, 256 }
  0xb4   :  { %407 = vmatpush.bf16.msra.mxu3 %v344_v25  ;;  %v600_v8 = vpop.eup %599 }
  0xb5   :  { %v602_v27 = vpop.eup %601  ;;  %v341_v28 = vpack.c.bf16 %v596_v26, %v600_v8 }
  0xb6   :  { %v342_v29 = vpack.c.bf16 %v598_v3, %v602_v27 }
  0xb7   :  { %389 = vmatpush.bf16.msra.mxu2 %v341_v28  ;;  %v437_v57 = vpop.permute.xlu0 %436 }
  0xb8   :  { %408 = vmatpush.bf16.msra.mxu3 %v342_v29 }
  0xba   :  { %570 = vmatmul.msk.bf16.vlgmr.msra.gmra.mxu2 %vm375_vm1, %v580_v30 }
  0xbb   :  { %572 = vmatmul.msk.bf16.vlgmr.msra.gmra.mxu3 %vm375_vm1, %v580_v30 }
  0xca   :  { %571 = vmatmul.msk.bf16.gmra.mxu2 %vm375_vm1, %v581_v31 }
  0xcb   :  { %573 = vmatmul.msk.bf16.gmra.mxu3 %vm375_vm1, %v581_v31 }
 0x13d   :  { %v391_v32 = vpop.f32.mrf.mxu2 }
 0x13e   :  { %v410_v33 = vpop.f32.mrf.mxu3  ;;  %v392_v38 = vadd.f32 %v391_v32, %v348_v48 }
 0x13f   :  { %v411_v53 = vadd.f32 %v410_v33, %v348_v48 }
 0x145   :  { %v393_v34 = vpop.f32.mrf.mxu2 }
 0x146   :  { %v412_v35 = vpop.f32.mrf.mxu3  ;;  %v394_v50 = vadd.f32 %v393_v34, %v353_v43 }
 0x147   :  { %v413_v52 = vadd.f32 %v412_v35, %v353_v43 }
 0x14d   :  { %v396_v37 = vpop.f32.mrf.mxu2 }
 0x14e   :  { %v415_v40 = vpop.f32.mrf.mxu3  ;;  %v397_v45 = vadd.f32 %v396_v37, %v358_v36 }
 0x14f   :  { %v416_v46 = vadd.f32 %v415_v40, %v358_v36 }
 0x150   :  { %603 = vtanh.f32 %v397_v45 }
 0x151   :  { %605 = vtanh.f32 %v416_v46 }
 0x155   :  { %v398_v49 = vpop.f32.mrf.mxu2 }
 0x156   :  { %v399_v41 = vadd.f32 %v398_v49, %v363_v47  ;;  %v417_v51 = vpop.f32.mrf.mxu3  ;;  %v604_v55 = vpop.eup %603 }
 0x157   :  { %v418_v54 = vadd.f32 %v417_v51, %v363_v47  ;;  %v606_v58 = vpop.eup %605 }
 0x158   :  { %607 = vtanh.f32 %v399_v41 }
 0x159   :  { %609 = vtanh.f32 %v418_v54 }
 0x15a   :  { %611 = vtanh.f32 %v394_v50 }
 0x15b   :  { %613 = vtanh.f32 %v413_v52 }
 0x15c   :  { %615 = vtanh.f32 %v392_v38 }
 0x15d   :  { %617 = vtanh.f32 %v411_v53 }
 0x15e   :  { %v608_v59 = vpop.eup %607 }
 0x15f   :  { %v610_v62 = vpop.eup %609  ;;  %v432_v42 = vpack.c.bf16 %v608_v59, %v604_v55 }
 0x160   :  { %v612_v44 = vpop.eup %611  ;;  %v433_v63 = vpack.c.bf16 %v610_v62, %v606_v58 }
 0x161   :  { %v614_v0 = vpop.eup %613  ;;  %448 = vmatpush.bf16.msrb.mxu0 %v432_v42 }
 0x162   :  { %v616_v39 = vpop.eup %615  ;;  %461 = vmatpush.bf16.msrb.mxu1 %v433_v63 }
 0x163   :  { %v618_v1 = vpop.eup %617  ;;  %v430_v56 = vpack.c.bf16 %v612_v44, %v616_v39 }
 0x164   :  { %v431_v2 = vpack.c.bf16 %v614_v0, %v618_v1 }
 0x165   :  { %449 = vmatpush.bf16.msrb.mxu0 %v430_v56 }
 0x166   :  { %462 = vmatpush.bf16.msrb.mxu1 %v431_v2 }
 0x168   :  { %574 = vmatmul.msk.bf16.vlgmr.msrb.gmra.mxu0 %vm375_vm1, %v428_v4 }
 0x169   :  { %575 = vmatmul.msk.bf16.vlgmr.msrb.gmra.mxu1 %vm375_vm1, %v428_v4 }
 0x1e5   :  { %v451_v5 = vpop.f32.mrf.mxu0 }
 0x1e6   :  { %v452_v6 = vadd.f32 %v451_v5, %v437_v57  ;;  %v464_v7 = vpop.f32.mrf.mxu1 }
 0x1e7   :  { %v465_v60 = vadd.f32 %v464_v7, %v437_v57 }
 0x1e8   :  { %v576_v9 = vmul.f32 -1.442695, %v452_v6  ;;  %518 = vst [vmem:[#allocation2] sm:$0xe] %v452_v6  ;;  %v520_v10 = vmul.f32 1.442695, %v452_v6 }
 0x1e9   :  { %v577_v11 = vmul.f32 -1.442695, %v465_v60  ;;  %519 = vst [vmem:[#allocation2 + $0x8] sm:$0xe] %v465_v60  ;;  %v522_v12 = vmul.f32 1.442695, %v465_v60 }
 0x1ea   :  { %619 = vpow2.f32 %v576_v9 }
 0x1eb   :  { %621 = vpow2.f32 %v520_v10 }
 0x1ec   :  { %623 = vpow2.f32 %v577_v11 }
 0x1ed   :  { %625 = vpow2.f32 %v522_v12  ;;  %v453_v13 = vpop.f32.mrf.mxu0 }
 0x1ee   :  { %v466_v61 = vpop.f32.mrf.mxu1 }
 0x1f0   :  { %v620_v14 = vpop.eup %619 }
 0x1f1   :  { %v622_v15 = vpop.eup %621  ;;  %v474_v16 = vadd.f32 1.0, %v620_v14 }
 0x1f2   :  { %v624_v17 = vpop.eup %623  ;;  %526 = vst [vmem:[#allocation1] sm:$0xff] %v622_v15 }
 0x1f3   :  { %v626_v18 = vpop.eup %625  ;;  %627 = vrcp.f32 %v474_v16  ;;  %v475_v19 = vadd.f32 1.0, %v624_v17  ;;  %vm481_vm5 = vweird.f32 %v474_v16  ;;  %v487_v32 = vand.u32 2147483648, %v474_v16 }
 0x1f4   :  { %527 = vst [vmem:[#allocation1 + $0x9] sm:$0xff] %v626_v18  ;;  %v485_v34 = vand.u32 2147483647, %v474_v16 }
 0x1f5   :  { %629 = vrcp.f32 %v475_v19  ;;  %v502_v28 = vand.u32 2147483648, %v475_v19  ;;  %v500_v30 = vand.u32 2147483647, %v475_v19  ;;  %vm496_vm6 = vweird.f32 %v475_v19 }
 0x1f6   :  { %v488_v45 = vor.u32 1.1754944e-38, %v487_v32  ;;  %vm486_vm11 = vcmp.eq.f32.partialorder %v485_v34, 8.507059e+37 }
 0x1f7   :  { %v503_v36 = vor.u32 1.1754944e-38, %v502_v28  ;;  %vm501_vm9 = vcmp.eq.f32.partialorder %v500_v30, 8.507059e+37 }
 0x1f9   :  { %v628_v21 = vpop.eup %627 }
 0x1fa   :  { %v477_v23 = vmul.f32 %v628_v21, %v474_v16  ;;  %vm482_vm3 = vweird.f32 %v628_v21 }
 0x1fb   :  { %v630_v24 = vpop.eup %629  ;;  %v529_v25 = vld [vmem:[#allocation1 + $0x4] ss:$9 sm:$0xff]  ;;  %vm891_vm7 = vmor %vm481_vm5, %vm482_vm3 }
 0x1fc   :  { %v478_v26 = vsub.f32 1.0, %v477_v23  ;;  %v492_v3 = vmul.f32 %v630_v24, %v475_v19  ;;  %532 = vst.msk [vmem:[#allocation2 + $0x4] ss:$8 sm:$0x3] %vm885_vm2, %v529_v25  ;;  %vm497_vm4 = vweird.f32 %v630_v24 }
 0x1fd   :  { %vm498_vm8 = vmor %vm496_vm6, %vm497_vm4 }
 0x1fe   :  { %v479_v8 = vmul.f32 %v628_v21, %v478_v26  ;;  %v493_v27 = vsub.f32 1.0, %v492_v3 }
 0x200   :  { %v494_v29 = vmul.f32 %v630_v24, %v493_v27  ;;  %v480_v31 = vadd.f32 %v628_v21, %v479_v8 }
 0x202   :  { %v495_v35 = vadd.f32 %v630_v24, %v494_v29  ;;  %v484_v37 = vsel %vm891_vm7, %v628_v21, %v480_v31 }
 0x203   :  { %v489_v47 = vsel %vm486_vm11, %v488_v45, %v484_v37 }
 0x204   :  { %v499_v40 = vsel %vm498_vm8, %v630_v24, %v495_v35 }
 0x205   :  { %v504_v46 = vsel %vm501_vm9, %v503_v36, %v499_v40 }
 0x206   :  { %v508_v43 = vrot.slane %v504_v46, 7 }
 0x208   :  { %v510_v49 = vsel %vm509_vm10, %v489_v47, %v508_v43 }
 0x209   :  { %516 = vst.msk [vmem:[#allocation2] ss:$8 sm:$0x3] %vm885_vm2, %v510_v49 }
 0x20a   :  { %544 = dma.vmem_to_hbm [thread:$0]  %s540_s30, 256, %s542_s17, [#allocation3]  }
 0x20b   :  { %655 = dma.done.wait [#allocation3], 256  }
 0x20c   :  { %656 = vsyncadd [#allocation3], 4294967040 }
 0x20d   :  { %549 = vsyncpa [#allocation3], 1 }

</bundles_post_ra>
